<compile_context>
chip_gen: v5e
topology: v5e:2x2
jax: 0.10.0
libtpu: 0.0.40
codegen_flags: <defaults>
</compile_context>

<pallas_src>
import jax
import jax.numpy as jnp
from jax.experimental import pallas as pl
from jax.experimental.pallas import tpu as pltpu

PAD_ID = 0


def _round_up(x, m):
    return ((x + m - 1) // m) * m


# ----------------------------------------------------------------------------
# Generation-aware sizing (VMEM is 128 MiB on v5e/v6e, 64 MiB per-TC on v7x).
# ----------------------------------------------------------------------------
def _tpu_vmem_bytes():
    try:
        return int(pltpu.get_tpu_info().vmem_capacity_bytes)
    except Exception:
        return 64 * 1024 * 1024          # conservative fallback (v7x-sized)


def _hw_config():
    vmem = _tpu_vmem_bytes()
    if vmem >= 96 * 1024 * 1024:         # v5e / v6e (128 MiB VMEM)
        return dict(budget=80 * 1024 * 1024, tm_target=1024,
                    vmem_limit=100 * 1024 * 1024)
    # v7x (64 MiB per TC) or unknown
    return dict(budget=36 * 1024 * 1024, tm_target=512,
                vmem_limit=48 * 1024 * 1024)


# ----------------------------------------------------------------------------
# Stage 1: encoder FFN + decoder cross-attention -> decoder hidden states.
# Processes G examples per grid step so weight matmuls get an M dim of G*S.
# ----------------------------------------------------------------------------
def attn_kernel(src_ref, tgt_ref, w_enc_ref, w_q_ref, w_k_ref, w_v_ref,
                w_o_ref, h_ref):
    G, Ss, D = src_ref.shape
    St = tgt_ref.shape[1]
    scale = 1.0 / (float(D) ** 0.5)

    # --- encoder (simplified single FFN layer), bf16 MXU / f32 accumulate ---
    src2 = src_ref[...].reshape(G * Ss, D)                     # bf16
    enc2 = jnp.maximum(
        jnp.dot(src2, w_enc_ref[...], preferred_element_type=jnp.float32), 0.0)
    enc_b = enc2.astype(jnp.bfloat16)

    # --- decoder cross-attention over encoder states ---
    tgt = tgt_ref[...]                                         # (G, St, D) bf16
    tgt2 = tgt.reshape(G * St, D)
    q2 = jnp.dot(tgt2, w_q_ref[...], preferred_element_type=jnp.float32)
    k2 = jnp.dot(enc_b, w_k_ref[...], preferred_element_type=jnp.float32)
    v2 = jnp.dot(enc_b, w_v_ref[...], preferred_element_type=jnp.float32)

    # fold 1/sqrt(D) into q (scales G*St*D elems instead of G*St*Ss scores)
    q = (q2 * scale).astype(jnp.bfloat16).reshape(G, St, D)
    k = k2.astype(jnp.bfloat16).reshape(G, Ss, D)
    v = v2.astype(jnp.bfloat16).reshape(G, Ss, D)

    scores = jnp.einsum("gtd,gsd->gts", q, k,
                        preferred_element_type=jnp.float32)    # (G, St, Ss) f32
    m = jnp.max(scores, axis=-1, keepdims=True)
    p = jnp.exp(scores - m)                                    # unnormalized
    denom = jnp.sum(p, axis=-1, keepdims=True)
    ctx = jnp.einsum("gts,gsd->gtd", p.astype(jnp.bfloat16), v,
                     preferred_element_type=jnp.float32)       # (G, St, D)
    ctx = ctx * pl.reciprocal(denom, approx=True)              # softmax norm (EUP)

    o = jnp.maximum(
        jnp.dot(ctx.reshape(G * St, D).astype(jnp.bfloat16), w_o_ref[...],
                preferred_element_type=jnp.float32), 0.0)
    h = tgt.astype(jnp.float32) + o.reshape(G, St, D)
    h_ref[...] = h.astype(jnp.bfloat16)                        # bf16 handoff


# ----------------------------------------------------------------------------
# Stage 2: vocab-tiled projection + masked cross-entropy (streaming LSE).
# Grid = (row_blocks, vocab_tiles); vocab is the (arbitrary) reduction axis.
# ----------------------------------------------------------------------------
def vocab_ce_kernel(h_ref, lab_ref, w_ref, out_ref, m_scr, s_scr, t_scr):
    v_idx = pl.program_id(1)
    nv = pl.num_programs(1)
    TM = h_ref.shape[0]
    TV = w_ref.shape[-1]

    @pl.when(v_idx == 0)
    def _():
        m_scr[...] = jnp.full_like(m_scr, -jnp.inf)
        s_scr[...] = jnp.zeros_like(s_scr)
        t_scr[...] = jnp.zeros_like(t_scr)

    # partial logits for this vocab tile (bf16 MXU inputs, f32 accumulation)
    logits = jnp.dot(h_ref[...], w_ref[...],
                     preferred_element_type=jnp.float32)        # (TM, TV)

    # streaming logsumexp update (f32)
    tile_max = jnp.max(logits, axis=-1, keepdims=True)
    m_prev = m_scr[...]
    m_new = jnp.maximum(m_prev, tile_max)
    s_scr[...] = (s_scr[...] * jnp.exp(m_prev - m_new)
                  + jnp.sum(jnp.exp(logits - m_new), axis=-1, keepdims=True))
    m_scr[...] = m_new

    # accumulate the target-token logit using a tile-local id compare
    lab = lab_ref[...]                                          # (TM, 1) int32
    lab_local = lab - v_idx * TV
    local_ids = jax.lax.broadcasted_iota(jnp.int32, (TM, TV), 1)
    hit = (local_ids == lab_local).astype(jnp.float32)
    t_scr[...] += jnp.sum(logits * hit, axis=-1, keepdims=True)

    @pl.when(v_idx == nv - 1)
    def _():
        lse = m_scr[...] + jnp.log(s_scr[...])
        mask = (lab != PAD_ID).astype(jnp.float32)
        nll = (lse - t_scr[...]) * mask                          # (TM, 1)
        loss_val = jnp.sum(nll)
        cnt_val = jnp.sum(mask)
        # single lane-dense output block: lane0 = loss sum, lane1 = token count
        lane = jax.lax.broadcasted_iota(jnp.int32, (1, 1, 128), 2)
        out_ref[...] = jnp.where(lane == 0, loss_val,
                                 jnp.where(lane == 1, cnt_val, 0.0))


# ----------------------------------------------------------------------------
# Tiling heuristics
# ----------------------------------------------------------------------------
def _pick_g(B, S_src, S_tgt, D, budget_bytes):
    """Largest divisor of B whose stage-1 working set fits the VMEM budget."""
    best = 1
    for g in range(1, B + 1):
        if B % g:
            continue
        io = 2 * (g * S_src * D * 2 + 2 * g * S_tgt * D * 2)       # bf16 in/out, dbl-buf
        inter = g * S_tgt * S_src * 4 + 4 * g * max(S_src, S_tgt) * D * 4
        w = 5 * 2 * D * D * 2                                       # 5 weights, dbl-buf
        if io + inter + w <= budget_bytes:
            best = g
    return best


def _pick_tm(R, tm_target):
    """Row block (MXU M dim): as large as the per-generation target allows,
    preferring a value that divides R so the jnp.pad copy is avoided."""
    r8 = _round_up(R, 8)
    cap = max(8, (min(tm_target, r8) // 8) * 8)
    if R % 8 == 0:
        for tm in range(cap, max(cap // 2, 8) - 1, -8):
            if R % tm == 0:
                return tm
    return cap


def _pick_tv(V, D, TM, budget_bytes):
    """Largest vocab tile TV (multiple of 128, dividing V) whose working set
    (double-buffered bf16 weight tile + f32 logits + double-buffered bf16 h
    block) fits the generation-aware VMEM budget."""
    best = None
    fixed = 2 * TM * D * 2 + 4 * TM * 4     # h (bf16, dbl-buf) + lab/scratch
    tv = 128
    while tv <= V:
        if V % tv == 0:
            need = 2 * D * tv * 2 + TM * tv * 4 + fixed
            if need <= budget_bytes:
                best = tv
        tv += 128
    return best


# ----------------------------------------------------------------------------
# Wrappers
# ----------------------------------------------------------------------------
def prepare_params(params):
    """One-time bf16 cast of the model weights (keeps the per-step path free of
    a full f32->bf16 HBM pass over the vocab matrix)."""
    bf = lambda x: x.astype(jnp.bfloat16)
    return {
        "embed":   bf(params["embed"]),
        "w_enc":   bf(params["w_enc"]),
        "w_q":     bf(params["w_q"]),
        "w_k":     bf(params["w_k"]),
        "w_v":     bf(params["w_v"]),
        "w_o":     bf(params["w_o"]),
        "w_vocab": bf(params["w_vocab"]),
    }


def seq2seq_loss(src_emb, tgt_emb, labels, prepared, tv=None):
    B, S_src, D = src_emb.shape
    _, S_tgt, _ = tgt_emb.shape
    V = prepared["w_vocab"].shape[-1]
    cfg = _hw_config()

    # --- stage 1: packed per-group attention -> decoder hidden states (bf16) ---
    G = _pick_g(B, S_src, S_tgt, D, cfg["budget"])
    NG = B // G
    dd_spec = pl.BlockSpec((D, D), lambda b: (0, 0))
    h = pl.pallas_call(
        attn_kernel,
        out_shape=jax.ShapeDtypeStruct((B, S_tgt, D), jnp.bfloat16),
        grid_spec=pltpu.PrefetchScalarGridSpec(
            num_scalar_prefetch=0,
            grid=(NG,),
            in_specs=[
                pl.BlockSpec((G, S_src, D), lambda b: (b, 0, 0)),
                pl.BlockSpec((G, S_tgt, D), lambda b: (b, 0, 0)),
                dd_spec, dd_spec, dd_spec, dd_spec, dd_spec,
            ],
            out_specs=pl.BlockSpec((G, S_tgt, D), lambda b: (b, 0, 0)),
        ),
        compiler_params=pltpu.CompilerParams(
            dimension_semantics=("parallel",),
            vmem_limit_bytes=cfg["vmem_limit"]),
    )(src_emb, tgt_emb,
      prepared["w_enc"], prepared["w_q"], prepared["w_k"],
      prepared["w_v"], prepared["w_o"])

    # --- stage 2: flatten rows, tile vocab, streaming masked cross-entropy ---
    R = B * S_tgt
    TM = _pick_tm(R, cfg["tm_target"])
    TV = tv
    if TV is None:
        while True:
            TV = _pick_tv(V, D, TM, cfg["budget"])
            if TV is not None or TM <= 8:
                break
            TM = max(8, ((TM // 2) // 8) * 8)   # shrink rows until a tile fits
        if TV is None:
            TV = V                              # small-vocab last resort
    assert V % TV == 0, (V, TV)
    NV = V // TV

    R_pad = _round_up(R, TM)
    NB = R_pad // TM
    h_flat = h.reshape(R, D)
    lab = labels.reshape(R).astype(jnp.int32)
    if R_pad > R:
        # TODO(synk): ragged tail could be handled with an in-kernel row mask
        # instead of this pad copy; TM is chosen to divide R when possible.
        h_flat = jnp.pad(h_flat, ((0, R_pad - R), (0, 0)))
        lab = jnp.pad(lab, (0, R_pad - R), constant_values=PAD_ID)
    lab = lab.reshape(R_pad, 1)

    out = pl.pallas_call(
        vocab_ce_kernel,
        out_shape=jax.ShapeDtypeStruct((NB, 1, 128), jnp.float32),
        grid_spec=pltpu.PrefetchScalarGridSpec(
            num_scalar_prefetch=0,
            grid=(NB, NV),                          # vocab reduction axis last
            in_specs=[
                pl.BlockSpec((TM, D), lambda i, v: (i, 0)),
                pl.BlockSpec((TM, 1), lambda i, v: (i, 0)),
                pl.BlockSpec((D, TV), lambda i, v: (0, v)),
            ],
            out_specs=pl.BlockSpec((1, 1, 128), lambda i, v: (i, 0, 0)),
            scratch_shapes=[pltpu.VMEM((TM, 1), jnp.float32)] * 3,
        ),
        compiler_params=pltpu.CompilerParams(
            dimension_semantics=("parallel", "arbitrary"),
            vmem_limit_bytes=cfg["vmem_limit"]),
    )(h_flat, lab, prepared["w_vocab"])

    loss_sum = jnp.sum(out[:, 0, 0])
    n_tok = jnp.maximum(jnp.sum(out[:, 0, 1]), 1.0)
    return loss_sum / n_tok


def model_wrapper_forward(batch, params, prepared=None, tv=None):
    """Mirrors ModelWrapper.forward: returns {'loss': scalar}."""
    if prepared is None:
        prepared = prepare_params(params)
    src_emb = prepared["embed"][batch["source"]]        # bf16 (B, S_src, D)
    tgt_emb = prepared["embed"][batch["target_input"]]  # bf16 (B, S_tgt, D)
    loss = seq2seq_loss(src_emb, tgt_emb, batch["target_output"], prepared,
                        tv=tv)
    return {"loss": loss}


# TODO(synk): ModelWrapper.predict (beam-search decoding, length penalty) is a
# data-dependent autoregressive loop with no clean single-Pallas-kernel
# equivalent; it is not implemented here.


def init_params(key, vocab, hidden):
    ks = jax.random.split(key, 7)
    s = 0.02
    return {
        "embed":   jax.random.normal(ks[0], (vocab, hidden), jnp.float32) * s,
        "w_enc":   jax.random.normal(ks[1], (hidden, hidden), jnp.float32) * s,
        "w_q":     jax.random.normal(ks[2], (hidden, hidden), jnp.float32) * s,
        "w_k":     jax.random.normal(ks[3], (hidden, hidden), jnp.float32) * s,
        "w_v":     jax.random.normal(ks[4], (hidden, hidden), jnp.float32) * s,
        "w_o":     jax.random.normal(ks[5], (hidden, hidden), jnp.float32) * s,
        "w_vocab": jax.random.normal(ks[6], (hidden, vocab), jnp.float32) * s,
    }


def _ref_loss(batch, params):
    """Pure-JAX f32 reference of the same forward pass."""
    src = params["embed"][batch["source"]]
    tgt = params["embed"][batch["target_input"]]
    lab = batch["target_output"].astype(jnp.int32)
    D = src.shape[-1]
    enc = jnp.maximum(jnp.einsum("bsd,de->bse", src, params["w_enc"]), 0.0)
    q = jnp.einsum("btd,de->bte", tgt, params["w_q"])
    k = jnp.einsum("bsd,de->bse", enc, params["w_k"])
    v = jnp.einsum("bsd,de->bse", enc, params["w_v"])
    sc = jnp.einsum("bte,bse->bts", q, k) / jnp.sqrt(jnp.float32(D))
    p = jax.nn.softmax(sc, axis=-1)
    ctx = jnp.einsum("bts,bse->bte", p, v)
    h = tgt + jnp.maximum(jnp.einsum("bte,ed->btd", ctx, params["w_o"]), 0.0)
    logits = jnp.einsum("btd,dv->btv", h, params["w_vocab"])
    logp = jax.nn.log_softmax(logits, axis=-1)
    tok = jnp.take_along_axis(logp, lab[..., None], axis=-1)[..., 0]
    mask = (lab != PAD_ID).astype(jnp.float32)
    return -(tok * mask).sum() / jnp.maximum(mask.sum(), 1.0)


if __name__ == "__main__":
    B, S_SRC, S_TGT, D, V = 2, 8, 8, 128, 1024

    key = jax.random.PRNGKey(0)
    k_tok, k_param = jax.random.split(key)
    k1, k2, k3 = jax.random.split(k_tok, 3)

    source = jax.random.randint(k1, (B, S_SRC), 1, V)
    target_input = jax.random.randint(k2, (B, S_TGT), 1, V)
    target_output = jax.random.randint(k3, (B, S_TGT), 1, V)
    # add PAD tokens to exercise the label mask
    target_output = target_output.at[:, -1].set(PAD_ID)

    params = init_params(k_param, V, D)
    prepared = prepare_params(params)   # one-time bf16 cast of the weights
    batch = {"source": source,
             "target_input": target_input,
             "target_output": target_output}

    # tv=256 -> 4 vocab tiles, exercising the streaming-logsumexp path.
    out = model_wrapper_forward(batch, params, prepared=prepared, tv=256)
    loss = jax.block_until_ready(out["loss"])
    ref = jax.block_until_ready(_ref_loss(batch, params))

    assert loss.shape == () and bool(jnp.isfinite(loss))
    assert abs(float(loss) - float(ref)) < 5e-2, (float(loss), float(ref))
    print("KERNEL_OK")
</pallas_src>

<mosaic_0001>
module attributes {stable_mosaic.version = 11 : i64} {
  func.func @attn_kernel(%arg0: i32, %arg1: memref<2x8x128xbf16, #tpu.memory_space<vmem>>, %arg2: memref<2x8x128xbf16, #tpu.memory_space<vmem>>, %arg3: memref<128x128xbf16, #tpu.memory_space<vmem>>, %arg4: memref<128x128xbf16, #tpu.memory_space<vmem>>, %arg5: memref<128x128xbf16, #tpu.memory_space<vmem>>, %arg6: memref<128x128xbf16, #tpu.memory_space<vmem>>, %arg7: memref<128x128xbf16, #tpu.memory_space<vmem>>, %arg8: memref<2x8x128xbf16, #tpu.memory_space<vmem>>) attributes {dimension_semantics = [#tpu.dimension_semantics<parallel>], iteration_bounds = array<i64: 1>, scalar_prefetch = 0 : i64, scratch_operands = 0 : i64, tpu.core_type = #tpu.core_type<tc>, window_params = [{transform_indices = @transform_0, window_bounds = array<i64: 2, 8, 128>}, {transform_indices = @transform_1, window_bounds = array<i64: 2, 8, 128>}, {pipeline_mode = #tpu.pipeline_mode<synchronous>, transform_indices = @transform_2, window_bounds = array<i64: 128, 128>}, {pipeline_mode = #tpu.pipeline_mode<synchronous>, transform_indices = @transform_3, window_bounds = array<i64: 128, 128>}, {pipeline_mode = #tpu.pipeline_mode<synchronous>, transform_indices = @transform_4, window_bounds = array<i64: 128, 128>}, {pipeline_mode = #tpu.pipeline_mode<synchronous>, transform_indices = @transform_5, window_bounds = array<i64: 128, 128>}, {pipeline_mode = #tpu.pipeline_mode<synchronous>, transform_indices = @transform_6, window_bounds = array<i64: 128, 128>}, {transform_indices = @transform_7, window_bounds = array<i64: 2, 8, 128>}]} {
    %c0 = arith.constant 0 : index
    %c0_0 = arith.constant 0 : index
    %c0_1 = arith.constant 0 : index
    %0 = vector.load %arg1[%c0, %c0_0, %c0_1] : memref<2x8x128xbf16, #tpu.memory_space<vmem>>, vector<2x8x128xbf16>
    %1 = vector.shape_cast %0 : vector<2x8x128xbf16> to vector<16x128xbf16>
    %c0_2 = arith.constant 0 : index
    %c0_3 = arith.constant 0 : index
    %2 = vector.load %arg3[%c0_2, %c0_3] : memref<128x128xbf16, #tpu.memory_space<vmem>>, vector<128x128xbf16>
    %cst = arith.constant dense<0.000000e+00> : vector<16x128xf32>
    %3 = tpu.matmul %1, %2, %cst {dimension_numbers = #tpu.dot_dimension_numbers<[1], [0], [0], [1], [0, 0, 1, 1], [], []>} : vector<16x128xbf16>, vector<128x128xbf16>, vector<16x128xf32> -> vector<16x128xf32>
    %cst_4 = arith.constant 0.000000e+00 : f32
    %4 = vector.broadcast %cst_4 : f32 to vector<16x128xf32>
    %5 = arith.maximumf %3, %4 : vector<16x128xf32>
    %6 = arith.truncf %5 : vector<16x128xf32> to vector<16x128xbf16>
    %c0_5 = arith.constant 0 : index
    %c0_6 = arith.constant 0 : index
    %c0_7 = arith.constant 0 : index
    %7 = vector.load %arg2[%c0_5, %c0_6, %c0_7] : memref<2x8x128xbf16, #tpu.memory_space<vmem>>, vector<2x8x128xbf16>
    %8 = vector.shape_cast %7 : vector<2x8x128xbf16> to vector<16x128xbf16>
    %c0_8 = arith.constant 0 : index
    %c0_9 = arith.constant 0 : index
    %9 = vector.load %arg4[%c0_8, %c0_9] : memref<128x128xbf16, #tpu.memory_space<vmem>>, vector<128x128xbf16>
    %cst_10 = arith.constant dense<0.000000e+00> : vector<16x128xf32>
    %10 = tpu.matmul %8, %9, %cst_10 {dimension_numbers = #tpu.dot_dimension_numbers<[1], [0], [0], [1], [0, 0, 1, 1], [], []>} : vector<16x128xbf16>, vector<128x128xbf16>, vector<16x128xf32> -> vector<16x128xf32>
    %c0_11 = arith.constant 0 : index
    %c0_12 = arith.constant 0 : index
    %11 = vector.load %arg5[%c0_11, %c0_12] : memref<128x128xbf16, #tpu.memory_space<vmem>>, vector<128x128xbf16>
    %cst_13 = arith.constant dense<0.000000e+00> : vector<16x128xf32>
    %12 = tpu.matmul %6, %11, %cst_13 {dimension_numbers = #tpu.dot_dimension_numbers<[1], [0], [0], [1], [0, 0, 1, 1], [], []>} : vector<16x128xbf16>, vector<128x128xbf16>, vector<16x128xf32> -> vector<16x128xf32>
    %c0_14 = arith.constant 0 : index
    %c0_15 = arith.constant 0 : index
    %13 = vector.load %arg6[%c0_14, %c0_15] : memref<128x128xbf16, #tpu.memory_space<vmem>>, vector<128x128xbf16>
    %cst_16 = arith.constant dense<0.000000e+00> : vector<16x128xf32>
    %14 = tpu.matmul %6, %13, %cst_16 {dimension_numbers = #tpu.dot_dimension_numbers<[1], [0], [0], [1], [0, 0, 1, 1], [], []>} : vector<16x128xbf16>, vector<128x128xbf16>, vector<16x128xf32> -> vector<16x128xf32>
    %cst_17 = arith.constant 0.0883883461 : f32
    %15 = vector.broadcast %cst_17 : f32 to vector<16x128xf32>
    %16 = arith.mulf %10, %15 : vector<16x128xf32>
    %17 = arith.truncf %16 : vector<16x128xf32> to vector<16x128xbf16>
    %18 = vector.shape_cast %17 : vector<16x128xbf16> to vector<2x8x128xbf16>
    %19 = arith.truncf %12 : vector<16x128xf32> to vector<16x128xbf16>
    %20 = vector.shape_cast %19 : vector<16x128xbf16> to vector<2x8x128xbf16>
    %21 = arith.truncf %14 : vector<16x128xf32> to vector<16x128xbf16>
    %22 = vector.shape_cast %21 : vector<16x128xbf16> to vector<2x8x128xbf16>
    "tpu.trace_start"() <{level = 10 : i32, message = "gtd,gsd->gts"}> : () -> ()
    %cst_18 = arith.constant dense<0.000000e+00> : vector<2x8x8xf32>
    %23 = tpu.matmul %18, %20, %cst_18 {dimension_numbers = #tpu.dot_dimension_numbers<[2], [2], [1], [1], [0, 0, 0, 1, 1, 1], [0], [0]>} : vector<2x8x128xbf16>, vector<2x8x128xbf16>, vector<2x8x8xf32> -> vector<2x8x8xf32>
    "tpu.trace_stop"() : () -> ()
    %cst_19 = arith.constant dense<0xFF800000> : vector<2x8xf32>
    %24 = vector.multi_reduction <maximumf>, %23, %cst_19 [2] : vector<2x8x8xf32> to vector<2x8xf32>
    %25 = vector.shape_cast %24 : vector<2x8xf32> to vector<2x8x1xf32>
    %26 = vector.broadcast %25 : vector<2x8x1xf32> to vector<2x8x8xf32>
    %27 = arith.subf %23, %26 : vector<2x8x8xf32>
    %28 = math.exp %27 : vector<2x8x8xf32>
    %cst_20 = arith.constant dense<0.000000e+00> : vector<2x8xf32>
    %29 = vector.multi_reduction <add>, %28, %cst_20 [2] : vector<2x8x8xf32> to vector<2x8xf32>
    %30 = vector.shape_cast %29 : vector<2x8xf32> to vector<2x8x1xf32>
    %31 = arith.truncf %28 : vector<2x8x8xf32> to vector<2x8x8xbf16>
    "tpu.trace_start"() <{level = 10 : i32, message = "gts,gsd->gtd"}> : () -> ()
    %cst_21 = arith.constant dense<0.000000e+00> : vector<2x8x128xf32>
    %32 = tpu.matmul %31, %22, %cst_21 {dimension_numbers = #tpu.dot_dimension_numbers<[2], [1], [1], [2], [0, 0, 0, 1, 1, 2], [0], [0]>} : vector<2x8x8xbf16>, vector<2x8x128xbf16>, vector<2x8x128xf32> -> vector<2x8x128xf32>
    "tpu.trace_stop"() : () -> ()
    %33 = tpu.reciprocal %30 {approx = true} : vector<2x8x1xf32> -> vector<2x8x1xf32>
    %34 = vector.broadcast %33 : vector<2x8x1xf32> to vector<2x8x128xf32>
    %35 = arith.mulf %32, %34 : vector<2x8x128xf32>
    %36 = vector.shape_cast %35 : vector<2x8x128xf32> to vector<16x128xf32>
    %37 = arith.truncf %36 : vector<16x128xf32> to vector<16x128xbf16>
    %c0_22 = arith.constant 0 : index
    %c0_23 = arith.constant 0 : index
    %38 = vector.load %arg7[%c0_22, %c0_23] : memref<128x128xbf16, #tpu.memory_space<vmem>>, vector<128x128xbf16>
    %cst_24 = arith.constant dense<0.000000e+00> : vector<16x128xf32>
    %39 = tpu.matmul %37, %38, %cst_24 {dimension_numbers = #tpu.dot_dimension_numbers<[1], [0], [0], [1], [0, 0, 1, 1], [], []>} : vector<16x128xbf16>, vector<128x128xbf16>, vector<16x128xf32> -> vector<16x128xf32>
    %cst_25 = arith.constant 0.000000e+00 : f32
    %40 = vector.broadcast %cst_25 : f32 to vector<16x128xf32>
    %41 = arith.maximumf %39, %40 : vector<16x128xf32>
    %42 = arith.extf %7 : vector<2x8x128xbf16> to vector<2x8x128xf32>
    %43 = vector.shape_cast %41 : vector<16x128xf32> to vector<2x8x128xf32>
    %44 = arith.addf %42, %43 : vector<2x8x128xf32>
    %45 = arith.truncf %44 : vector<2x8x128xf32> to vector<2x8x128xbf16>
    %c0_26 = arith.constant 0 : index
    %c0_27 = arith.constant 0 : index
    %c0_28 = arith.constant 0 : index
    %46 = vector.load %arg8[%c0_26, %c0_27, %c0_28] : memref<2x8x128xbf16, #tpu.memory_space<vmem>>, vector<2x8x128xbf16>
    tpu.vector_store %arg8[%c0_26, %c0_27, %c0_28], %45 {strides = array<i32>} : memref<2x8x128xbf16, #tpu.memory_space<vmem>>, vector<2x8x128xbf16>,
    return
  }
  func.func @transform_0(%arg0: i32) -> (i32, i32, i32) {
    %c0_i32 = arith.constant 0 : i32
    %c0_i32_0 = arith.constant 0 : i32
    %c0_i32_1 = arith.constant 0 : i32
    return %arg0, %c0_i32, %c0_i32_0 : i32, i32, i32
  }
  func.func @transform_1(%arg0: i32) -> (i32, i32, i32) {
    %c0_i32 = arith.constant 0 : i32
    %c0_i32_0 = arith.constant 0 : i32
    %c0_i32_1 = arith.constant 0 : i32
    return %arg0, %c0_i32, %c0_i32_0 : i32, i32, i32
  }
  func.func @transform_2(%arg0: i32) -> (i32, i32) {
    %c0_i32 = arith.constant 0 : i32
    %c0_i32_0 = arith.constant 0 : i32
    %c0_i32_1 = arith.constant 0 : i32
    return %c0_i32, %c0_i32_0 : i32, i32
  }
  func.func @transform_3(%arg0: i32) -> (i32, i32) {
    %c0_i32 = arith.constant 0 : i32
    %c0_i32_0 = arith.constant 0 : i32
    %c0_i32_1 = arith.constant 0 : i32
    return %c0_i32, %c0_i32_0 : i32, i32
  }
  func.func @transform_4(%arg0: i32) -> (i32, i32) {
    %c0_i32 = arith.constant 0 : i32
    %c0_i32_0 = arith.constant 0 : i32
    %c0_i32_1 = arith.constant 0 : i32
    return %c0_i32, %c0_i32_0 : i32, i32
  }
  func.func @transform_5(%arg0: i32) -> (i32, i32) {
    %c0_i32 = arith.constant 0 : i32
    %c0_i32_0 = arith.constant 0 : i32
    %c0_i32_1 = arith.constant 0 : i32
    return %c0_i32, %c0_i32_0 : i32, i32
  }
  func.func @transform_6(%arg0: i32) -> (i32, i32) {
    %c0_i32 = arith.constant 0 : i32
    %c0_i32_0 = arith.constant 0 : i32
    %c0_i32_1 = arith.constant 0 : i32
    return %c0_i32, %c0_i32_0 : i32, i32
  }
  func.func @transform_7(%arg0: i32) -> (i32, i32, i32) {
    %c0_i32 = arith.constant 0 : i32
    %c0_i32_0 = arith.constant 0 : i32
    %c0_i32_1 = arith.constant 0 : i32
    return %arg0, %c0_i32, %c0_i32_0 : i32, i32, i32
  }
}

</mosaic_0001>

<bundles_post_ra>
// kernel: tpu_custom_call.1
= control target key start
LH: loop header
LB: loop body
LE: loop exit
PB: predicated region body
PF: predicated region fallthrough
CT: control target
= control target key end

     0   :  { %12 = vsyncpa [#allocation3], 0  ;;  %s1218_s0 = inlined_call_operand.hbm [shape: bf16[2,8,128], index: 0, kind: input, shape index: {}]   ;;  %s1219_s1 = inlined_call_operand.hbm [shape: bf16[2,8,128], index: 1, kind: input, shape index: {}]   ;;  %s1220_s2 = inlined_call_operand.hbm [shape: bf16[128,128], index: 2, kind: input, shape index: {}]   ;;  %s1221_s3 = inlined_call_operand.hbm [shape: bf16[128,128], index: 3, kind: input, shape index: {}]   ;;  %s1222_s4 = inlined_call_operand.hbm [shape: bf16[128,128], index: 4, kind: input, shape index: {}]   ;;  %s1223_s5 = inlined_call_operand.hbm [shape: bf16[128,128], index: 5, kind: input, shape index: {}]   ;;  %s1224_s6 = inlined_call_operand.hbm [shape: bf16[128,128], index: 6, kind: input, shape index: {}]   ;;  %s1225_s7 = inlined_call_operand.hbm [shape: bf16[2,8,128], index: 7, kind: output, shape index: {}]  }
   0x1   :  { %13 = vsyncpa [#allocation6], 0 }
   0x2   :  { %14 = vsyncpa [#allocation9], 0 }
   0x3   :  { %15 = vsyncpa [#allocation12], 0 }
   0x4   :  { %16 = vsyncpa [#allocation4], 0  ;;  %s34_s26 = sshll.u32 %s1219_s1, 4  ;;  %s1114_s27 = smov [#allocation5]   ;;  %s35_s26 = int_to_ptr.hbm [resolvable:$true] %s34_s26 }
   0x5   :  { %s36_s28 = sshll.u32 %s1114_s27, 4  ;;  %s60_s8 = sshll.u32 %s1221_s3, 4  ;;  %s37_s28 = int_to_ptr.vmem [resolvable:$true] %s36_s28  ;;  %s61_s8 = int_to_ptr.hbm [resolvable:$true] %s60_s8 }
   0x6   :  { %s1115_s9 = smov 64   ;;  %s1116_s10 = smov 4  }
   0x7   :  { %42 = dma.hbm_to_vmem [thread:$0]  %s35_s26, 128, %s37_s28, [#allocation6], %s1115_s9, %s1115_s9, %s1116_s10  }
   0x8   :  { %s1117_s11 = smov [#allocation8]   ;;  %s86_s1 = sshll.u32 %s1223_s5, 4  ;;  %s87_s1 = int_to_ptr.hbm [resolvable:$true] %s86_s1 }
   0x9   :  { %s62_s12 = sshll.u32 %s1117_s11, 4  ;;  %s21_s16 = sshll.u32 %s1218_s0, 4  ;;  %s63_s12 = int_to_ptr.vmem [resolvable:$true] %s62_s12  ;;  %s22_s16 = int_to_ptr.hbm [resolvable:$true] %s21_s16 }
   0xa   :  { %68 = dma.hbm_to_vmem [thread:$0]  %s61_s8, 1024, %s63_s12, [#allocation9], %s1115_s9, %s1115_s9, %s1116_s10  }
   0xb   :  { %s1118_s17 = smov [#allocation11]   ;;  %s1119_s19 = smov [#allocation2]  }
   0xc   :  { %s88_s18 = sshll.u32 %s1118_s17, 4  ;;  %s23_s5 = sshll.u32 %s1119_s19, 4  ;;  %s89_s18 = int_to_ptr.vmem [resolvable:$true] %s88_s18  ;;  %s24_s5 = int_to_ptr.vmem [resolvable:$true] %s23_s5 }
   0xd   :  { %94 = dma.hbm_to_vmem [thread:$0]  %s87_s1, 1024, %s89_s18, [#allocation12], %s1115_s9, %s1115_s9, %s1116_s10  }
   0xe   :  { %s47_s22 = sshll.u32 %s1220_s2, 4  ;;  %s73_s24 = sshll.u32 %s1222_s4, 4  ;;  %s48_s22 = int_to_ptr.hbm [resolvable:$true] %s47_s22  ;;  %s74_s24 = int_to_ptr.hbm [resolvable:$true] %s73_s24 }
   0xf   :  { %29 = dma.hbm_to_vmem [thread:$0]  %s22_s16, 128, %s24_s5, [#allocation3], %s1115_s9, %s1115_s9, %s1116_s10  }
  0x10   :  { %s1120_s25 = smov [#allocation7]   ;;  %s1121_s27 = smov [#allocation10]  }
  0x11   :  { %s49_s26 = sshll.u32 %s1120_s25, 4  ;;  %s75_s2 = sshll.u32 %s1121_s27, 4  ;;  %s50_s26 = int_to_ptr.vmem [resolvable:$true] %s49_s26  ;;  %s76_s2 = int_to_ptr.vmem [resolvable:$true] %s75_s2 }
  0x12   :  { %55 = dma.hbm_to_vmem [thread:$0]  %s48_s22, 1024, %s50_s26, [#allocation6], %s1115_s9, %s1115_s9, %s1116_s10  }
  0x13   :  { %s99_s30 = sshll.u32 %s1224_s6, 4  ;;  %s1122_s4 = smov [#allocation13]   ;;  %s100_s30 = int_to_ptr.hbm [resolvable:$true] %s99_s30 }
  0x14   :  { %81 = dma.hbm_to_vmem [thread:$0]  %s74_s24, 1024, %s76_s2, [#allocation9], %s1115_s9, %s1115_s9, %s1116_s10  }
  0x15   :  { %s101_s8 = sshll.u32 %s1122_s4, 4  ;;  %s102_s8 = int_to_ptr.vmem [resolvable:$true] %s101_s8 }
  0x16   :  { %107 = dma.hbm_to_vmem [thread:$0]  %s100_s30, 1024, %s102_s8, [#allocation12], %s1115_s9, %s1115_s9, %s1116_s10  }
  0x17   :  { %1104 = dma.done.wait [#allocation3], 128  }
  0x18   :  { %1105 = vsyncadd [#allocation3], 4294967168 }
  0x19   :  { %1106 = dma.done.wait [#allocation6], 1152  }
  0x1a   :  { %1107 = vsyncadd [#allocation6], 4294966144 }
  0x1b   :  { %1108 = dma.done.wait [#allocation9], 2048  }
  0x1c   :  { %1109 = vsyncadd [#allocation9], 4294965248 }
  0x1d   :  { %1110 = dma.done.wait [#allocation12], 2048  }
  0x1e   :  { %1111 = vsyncadd [#allocation12], 4294965248  ;;  %v855_v0 = vld [vmem:[#allocation7 + $0x38] sm:$0xff]  ;;  %v854_v1 = vld [vmem:[#allocation7 + $0x30] sm:$0xff]  ;;  %vm526_vm0 = vcmask 1043456   ;;  %vm502_vm1 = vcmask 64512  }
  0x1f   :  { %209 = vmatpush.bf16.msra.mxu0 %v855_v0  ;;  %v872_v2 = vld [vmem:[#allocation10 + $0x38] sm:$0xff]  ;;  %v871_v4 = vld [vmem:[#allocation10 + $0x30] sm:$0xff]  ;;  %v853_v7 = vld [vmem:[#allocation7 + $0x28] sm:$0xff]  ;;  %s1123_s6 = smov [#allocation14]   ;;  %s661_s14 = sshll.u32 %s1225_s7, 4  ;;  %s662_s14 = int_to_ptr.hbm [resolvable:$true] %s661_s14 }
  0x20   :  { %v880_v3 = vld [vmem:[#allocation11 + $0x38] sm:$0xff]  ;;  %376 = vmatpush.bf16.msra.mxu2 %v872_v2  ;;  %v879_v5 = vld [vmem:[#allocation11 + $0x30] sm:$0xff]  ;;  %v870_v9 = vld [vmem:[#allocation10 + $0x28] sm:$0xff]  ;;  %s659_s11 = sshll.u32 %s1123_s6, 4  ;;  %s660_s11 = int_to_ptr.vmem [resolvable:$true] %s659_s11 }
  0x21   :  { %454 = vmatpush.bf16.msra.mxu3 %v880_v3  ;;  %v864_v6 = vld [vmem:[#allocation8 + $0x38] sm:$0xff]  ;;  %v863_v8 = vld [vmem:[#allocation8 + $0x30] sm:$0xff]  ;;  %v878_v10 = vld [vmem:[#allocation11 + $0x28] sm:$0xff] }
  0x22   :  { %298 = vmatpush.bf16.msra.mxu1 %v864_v6  ;;  %v852_v11 = vld [vmem:[#allocation7 + $0x20] sm:$0xff]  ;;  %v851_v14 = vld [vmem:[#allocation7 + $0x18] sm:$0xff]  ;;  %v850_v17 = vld [vmem:[#allocation7 + $0x10] sm:$0xff] }
  0x23   :  { %210 = vmatpush.bf16.msra.mxu0 %v854_v1  ;;  %v869_v12 = vld [vmem:[#allocation10 + $0x20] sm:$0xff]  ;;  %v868_v15 = vld [vmem:[#allocation10 + $0x18] sm:$0xff]  ;;  %v849_v18 = vld [vmem:[#allocation7 + $0x8] sm:$0xff] }
  0x24   :  { %377 = vmatpush.bf16.msra.mxu2 %v871_v4  ;;  %v877_v13 = vld [vmem:[#allocation11 + $0x20] sm:$0xff]  ;;  %v876_v16 = vld [vmem:[#allocation11 + $0x18] sm:$0xff]  ;;  %v847_v20 = vld [vmem:[#allocation2] sm:$0xff] }
  0x25   :  { %455 = vmatpush.bf16.msra.mxu3 %v879_v5  ;;  %v848_v19 = vld [vmem:[#allocation7] sm:$0xff]  ;;  %v862_v21 = vld [vmem:[#allocation8 + $0x28] sm:$0xff]  ;;  %v860_v23 = vld [vmem:[#allocation8 + $0x18] sm:$0xff] }
  0x26   :  { %299 = vmatpush.bf16.msra.mxu1 %v863_v8  ;;  %v861_v22 = vld [vmem:[#allocation8 + $0x20] sm:$0xff]  ;;  %v867_v24 = vld [vmem:[#allocation10 + $0x10] sm:$0xff]  ;;  %v866_v26 = vld [vmem:[#allocation10 + $0x8] sm:$0xff] }
  0x27   :  { %211 = vmatpush.bf16.msra.mxu0 %v853_v7  ;;  %v875_v25 = vld [vmem:[#allocation11 + $0x10] sm:$0xff]  ;;  %v874_v27 = vld [vmem:[#allocation11 + $0x8] sm:$0xff]  ;;  %v865_v30 = vld [vmem:[#allocation10] sm:$0xff] }
  0x28   :  { %378 = vmatpush.bf16.msra.mxu2 %v870_v9  ;;  %v859_v28 = vld [vmem:[#allocation8 + $0x10] sm:$0xff]  ;;  %v858_v29 = vld [vmem:[#allocation8 + $0x8] sm:$0xff]  ;;  %v873_v31 = vld [vmem:[#allocation11] sm:$0xff] }
  0x29   :  { %456 = vmatpush.bf16.msra.mxu3 %v878_v10  ;;  %v857_v32 = vld [vmem:[#allocation8] sm:$0xff]  ;;  %v856_v33 = vld [vmem:[#allocation5] sm:$0xff]  ;;  %v887_v10 = vld [vmem:[#allocation13 + $0x30] sm:$0xff] }
  0x2a   :  { %300 = vmatpush.bf16.msra.mxu1 %v862_v21  ;;  %v888_v9 = vld [vmem:[#allocation13 + $0x38] sm:$0xff] }
  0x2b   :  { %212 = vmatpush.bf16.msra.mxu0 %v852_v11  ;;  %v886_v11 = vld [vmem:[#allocation13 + $0x28] sm:$0xff] }
  0x2c   :  { %379 = vmatpush.bf16.msra.mxu2 %v869_v12  ;;  %v885_v12 = vld [vmem:[#allocation13 + $0x20] sm:$0xff] }
  0x2d   :  { %457 = vmatpush.bf16.msra.mxu3 %v877_v13  ;;  %v884_v13 = vld [vmem:[#allocation13 + $0x18] sm:$0xff] }
  0x2e   :  { %301 = vmatpush.bf16.msra.mxu1 %v861_v22 }
  0x2f   :  { %213 = vmatpush.bf16.msra.mxu0 %v851_v14  ;;  %v883_v14 = vld [vmem:[#allocation13 + $0x10] sm:$0xff] }
  0x30   :  { %380 = vmatpush.bf16.msra.mxu2 %v868_v15  ;;  %v882_v15 = vld [vmem:[#allocation13 + $0x8] sm:$0xff] }
  0x31   :  { %458 = vmatpush.bf16.msra.mxu3 %v876_v16  ;;  %v881_v16 = vld [vmem:[#allocation13] sm:$0xff] }
  0x32   :  { %302 = vmatpush.bf16.msra.mxu1 %v860_v23 }
  0x33   :  { %214 = vmatpush.bf16.msra.mxu0 %v850_v17 }
  0x34   :  { %381 = vmatpush.bf16.msra.mxu2 %v867_v24 }
  0x35   :  { %459 = vmatpush.bf16.msra.mxu3 %v875_v25 }
  0x36   :  { %303 = vmatpush.bf16.msra.mxu1 %v859_v28 }
  0x37   :  { %215 = vmatpush.bf16.msra.mxu0 %v849_v18 }
  0x38   :  { %382 = vmatpush.bf16.msra.mxu2 %v866_v26 }
  0x39   :  { %460 = vmatpush.bf16.msra.mxu3 %v874_v27 }
  0x3a   :  { %304 = vmatpush.bf16.msra.mxu1 %v858_v29  ;;  %v226_v29 = vld [vmem:[#allocation5] sm:$0xff]  }
  0x3b   :  { %216 = vmatpush.bf16.msra.mxu0 %v848_v19 }
  0x3c   :  { %383 = vmatpush.bf16.msra.mxu2 %v865_v30 }
  0x3d   :  { %461 = vmatpush.bf16.msra.mxu3 %v873_v31  ;;  %v647_v31 = vunpack.c.l.bf16 %v226_v29 }
  0x3e   :  { %217 = vmatmul.bf16.vlgmr.msra.gmra.mxu0 %v847_v20  ;;  %305 = vmatpush.bf16.msra.mxu1 %v857_v32  ;;  %v648_v32 = vunpack.c.h.bf16 %v226_v29 }
  0x3f   :  { %631 = vmatpush.bf16.msrb.mxu0 %v888_v9 }
  0x41   :  { %306 = vmatmul.bf16.vlgmr.msra.gmra.mxu1 %v856_v33 }
  0x43   :  { %632 = vmatpush.bf16.msrb.mxu0 %v887_v10 }
  0x47   :  { %633 = vmatpush.bf16.msrb.mxu0 %v886_v11 }
  0x4b   :  { %634 = vmatpush.bf16.msrb.mxu0 %v885_v12 }
  0x4f   :  { %635 = vmatpush.bf16.msrb.mxu0 %v884_v13 }
  0x53   :  { %636 = vmatpush.bf16.msrb.mxu0 %v883_v14 }
  0x57   :  { %637 = vmatpush.bf16.msrb.mxu0 %v882_v15 }
  0x5b   :  { %638 = vmatpush.bf16.msrb.mxu0 %v881_v16 }
  0xbb   :  { %v218_v34 = vpop.f32.mrf.mxu0 }
  0xbc   :  { %v223_v36 = vmax.f32 %v218_v34, 0.0 }
  0xbe   :  { %v307_v43 = vpop.f32.mrf.mxu1 }
  0xbf   :  { %v468_v44 = vmul.f32 0.088388346, %v307_v43 }
  0xc1   :  { %v470_v46 = vpack.c.bf16 %v468_v44, %v468_v44 }
  0xc3   :  { %v220_v35 = vpop.f32.mrf.mxu0 }
  0xc4   :  { %v224_v37 = vmax.f32 %v220_v35, 0.0 }
  0xc6   :  { %v225_v38 = vpack.c.bf16 %v224_v37, %v223_v36  ;;  %v309_v52 = vpop.f32.mrf.mxu1 }
  0xc7   :  { %v469_v53 = vmul.f32 0.088388346, %v309_v52 }
  0xc8   :  { %384 = vmatmul.bf16.vlgmr.msra.gmra.mxu2 %v225_v38  ;;  %462 = vmatmul.bf16.vlgmr.msra.gmra.mxu3 %v225_v38 }
  0xc9   :  { %v471_v54 = vpack.c.bf16 %v469_v53, %v469_v53 }
 0x14b   :  { %v385_v39 = vpop.f32.mrf.mxu2  ;;  %v463_v40 = vpop.f32.mrf.mxu3 }
 0x14c   :  { %v472_v41 = vpack.c.bf16 %v385_v39, %v385_v39  ;;  %v474_v42 = vpack.c.bf16 %v463_v40, %v463_v40 }
 0x14e   :  { %483 = vmatpush.bf16.xpose.msrb.mxu1 %v472_v41  ;;  %v528_v45 = vsel %vm526_vm0, %v474_v42, 0 }
 0x14f   :  { %537 = vmatpush.bf16.msrb.mxu2 %v528_v45 }
 0x153   :  { %v387_v47 = vpop.f32.mrf.mxu2  ;;  %v465_v48 = vpop.f32.mrf.mxu3 }
 0x154   :  { %v473_v49 = vpack.c.bf16 %v387_v47, %v387_v47  ;;  %v475_v50 = vpack.c.bf16 %v465_v48, %v465_v48 }
 0x155   :  { %484 = vmatmul.bf16.vlgmr.msrb.gmra.mxu1 %v470_v46 }
 0x156   :  { %496 = vmatpush.bf16.xpose.msra.mxu1 %v473_v49  ;;  %v547_v51 = vsel %vm526_vm0, %v475_v50, 0 }
 0x157   :  { %556 = vmatpush.bf16.msrb.mxu3 %v547_v51 }
 0x165   :  { %497 = vmatmul.bf16.vlgmr.msra.gmra.mxu1 %v471_v54 }
 0x1d2   :  { %v485_v55 = vpop.f32.mrf.mxu1 }
 0x1d3   :  { %v503_v56 = vsel %vm502_vm1, %v485_v55, -inf }
 0x1d4   :  { %504 = vmax.xlane.f32.xlu0 %v503_v56 }
 0x1da   :  { %v487_v57 = vpop.f32.mrf.mxu1 }
 0x1e2   :  { %v498_v58 = vpop.f32.mrf.mxu1 }
 0x1e3   :  { %v506_v59 = vsel %vm502_vm1, %v498_v58, -inf }
 0x1e4   :  { %507 = vmax.xlane.f32.xlu0 %v506_v59 }
 0x1ea   :  { %v500_v60 = vpop.f32.mrf.mxu1 }
 0x247   :  { %v505_v61 = vpop.xlane.xlu0 %504 }
 0x248   :  { %v509_v62 = vsub.f32 %v485_v55, %v505_v61 }
 0x24a   :  { %v511_v63 = vmul.f32 1.442695, %v509_v62 }
 0x24c   :  { %904 = vpow2.f32 %v511_v63 }
 0x252   :  { %v905_v0 = vpop.eup %904 }
 0x253   :  { %v515_v1 = vsel %vm502_vm1, %v905_v0, 0.0  ;;  %v521_v2 = vpack.c.bf16 %v905_v0, %v905_v0 }
 0x254   :  { %516 = vadd.xlane.f32.xlu1 %v515_v1 }
 0x255   :  { %813 = vmatmul.msk.bf16.vlgmr.msrb.gmra.mxu2 %vm502_vm1, %v521_v2 }
 0x257   :  { %v508_v3 = vpop.xlane.xlu0 %507 }
 0x258   :  { %v510_v4 = vsub.f32 %v498_v58, %v508_v3 }
 0x25a   :  { %v513_v5 = vmul.f32 1.442695, %v510_v4 }
 0x25c   :  { %906 = vpow2.f32 %v513_v5 }
 0x262   :  { %v907_v6 = vpop.eup %906 }
 0x263   :  { %v518_v7 = vsel %vm502_vm1, %v907_v6, 0.0  ;;  %v522_v8 = vpack.c.bf16 %v907_v6, %v907_v6 }
 0x264   :  { %519 = vadd.xlane.f32.xlu1 %v518_v7 }
 0x265   :  { %814 = vmatmul.msk.bf16.vlgmr.msrb.gmra.mxu3 %vm502_vm1, %v522_v8 }
 0x2c7   :  { %v517_v17 = vpop.xlane.xlu1 %516 }
 0x2c8   :  { %908 = vrcp.f32 %v517_v17 }
 0x2ce   :  { %v909_v21 = vpop.eup %908 }
 0x2d7   :  { %v520_v19 = vpop.xlane.xlu1 %519 }
 0x2d8   :  { %v539_v18 = vpop.f32.mrf.mxu2  ;;  %910 = vrcp.f32 %v520_v19 }
 0x2d9   :  { %v564_v24 = vmul.f32 %v909_v21, %v539_v18 }
 0x2de   :  { %v911_v22 = vpop.eup %910 }
 0x2e0   :  { %v541_v20 = vpop.f32.mrf.mxu2 }
 0x2e8   :  { %v558_v23 = vpop.f32.mrf.mxu3 }
 0x2e9   :  { %v565_v25 = vmul.f32 %v911_v22, %v558_v23 }
 0x2eb   :  { %v566_v26 = vpack.c.bf16 %v565_v25, %v564_v24 }
 0x2ed   :  { %639 = vmatmul.bf16.vlgmr.msrb.gmra.mxu0 %v566_v26 }
 0x2f0   :  { %v560_v27 = vpop.f32.mrf.mxu3 }
 0x36a   :  { %v640_v28 = vpop.f32.mrf.mxu0 }
 0x36b   :  { %v645_v30 = vmax.f32 %v640_v28, 0.0 }
 0x36d   :  { %v649_v35 = vadd.f32 %v647_v31, %v645_v30 }
 0x372   :  { %v642_v33 = vpop.f32.mrf.mxu0 }
 0x373   :  { %v646_v34 = vmax.f32 %v642_v33, 0.0 }
 0x375   :  { %v650_v36 = vadd.f32 %v648_v32, %v646_v34 }
 0x377   :  { %v892_v37 = vpack.c.bf16 %v650_v36, %v649_v35 }
 0x379   :  { %893 = vst [vmem:[#allocation14] sm:$0xff] %v892_v37  }
 0x37a   :  { %667 = dma.vmem_to_hbm [thread:$0]  %s660_s11, 128, %s662_s14, [#allocation4], %s1115_s9, %s1115_s9, %s1116_s10  }
 0x37b   :  { %1112 = dma.done.wait [#allocation4], 128  }
 0x37c   :  { %1113 = vsyncadd [#allocation4], 4294967168 }
 0x37d   :  { %672 = vsyncpa [#allocation3], 1 }
 0x37e   :  { %673 = vsyncpa [#allocation6], 1 }
 0x37f   :  { %674 = vsyncpa [#allocation9], 1 }
 0x380   :  { %675 = vsyncpa [#allocation12], 1 }
 0x381   :  { %676 = vsyncpa [#allocation4], 1 }

</bundles_post_ra>
